<compile_context>
chip_gen: v7x
topology: tpu7x:2x2x1
jax: 0.10.0
libtpu: 0.0.40
codegen_flags: <defaults>
</compile_context>

<pallas_src>
import functools

import numpy as np
import jax
import jax.numpy as jnp
from jax import lax
from jax.experimental import pallas as pl
from jax.experimental.pallas import tpu as pltpu


def _round_up(x, m):
    return (x + m - 1) // m * m


def _wh_kernel(xp_ref, w1_ref, w2f_ref, a_ref, out_ref, *, fl, p, L1, W, Wo):
    """Processes one batch sample.

    xp_ref  : (1, Wx)    zero-padded input; real x starts at column 2*p.
    w1_ref  : (F, fl)    conv1 weight (in_ch squeezed).
    w2f_ref : (1, F*fl)  conv2 weight, flattened so column k*F + f == w2[f, k].
    a_ref   : (3,)       nonlinearity coefficients a0, a1, a2 (SMEM).
    out_ref : (1, Wo)    conv2 output; columns >= L2 are scratch, sliced off outside.
    """
    F = w1_ref.shape[0]
    a0 = a_ref[0]
    a1 = a_ref[1]
    a2 = a_ref[2]

    # ---- conv1: 1 -> F channels, lane-dense (F on sublanes, time on lanes). ----
    h = jnp.zeros((F, W), jnp.float32)
    for k in range(fl):
        h = h + w1_ref[:, k:k + 1] * xp_ref[:, k:k + W]          # (F,1)*(1,W) -> (F,W)

    # Keep only the valid conv1 output range [p, p+L1); the zeros outside it are
    # exactly conv2's zero padding of h (and the polynomial maps 0 -> 0).
    col = lax.broadcasted_iota(jnp.int32, (1, W), 1)
    h = jnp.where((col >= p) & (col < p + L1), h, 0.0)

    # ---- Hammerstein nonlinearity, Horner form: a0*h + a1*h^2 + a2*h^3. ----
    z = h * (a0 + h * (a1 + a2 * h))

    # ---- conv2: F -> 1 channel as a single MXU contraction over K = F*fl. ----
    zstack = jnp.concatenate([z[:, k:k + Wo] for k in range(fl)], axis=0)   # (F*fl, Wo)
    out_ref[...] = jnp.dot(w2f_ref[...], zstack,
                           preferred_element_type=jnp.float32)              # (1, Wo)


def wh_channel_net(x, w1, w2, a):
    """Pallas forward. x: (N,1,L), w1: (F,1,fl), w2: (1,F,fl), a: (3,). Returns (N,1,L2)."""
    N, _, L = x.shape
    F, _, fl = w1.shape
    assert fl - 1 <= 128, "filter_length assumed <= 129 for the fixed lane padding"
    p = fl // 2
    L1 = L + 2 * p - fl + 1            # conv1 output length
    L2 = L1 + 2 * p - fl + 1           # conv2 output length

    Wo = _round_up(L2, 128)            # lane-aligned output width
    W = Wo + 128                       # working width for h/z  (>= L1 + 2p, >= Wo + fl - 1)
    Wx = W + 128                       # padded input width     (>= W + fl - 1)

    xarr = jnp.zeros((N, 1, Wx), jnp.float32)
    xarr = xarr.at[:, 0, 2 * p:2 * p + L].set(x[:, 0, :].astype(jnp.float32))
    w1f = w1[:, 0, :].astype(jnp.float32)                                    # (F, fl)
    w2f = jnp.transpose(w2[0, :, :].astype(jnp.float32)).reshape(1, fl * F)  # (1, F*fl)
    a32 = a.astype(jnp.float32)

    kernel = functools.partial(_wh_kernel, fl=fl, p=p, L1=L1, W=W, Wo=Wo)
    y = pl.pallas_call(
        kernel,
        out_shape=jax.ShapeDtypeStruct((N, 1, Wo), jnp.float32),
        grid=(N,),
        in_specs=[
            pl.BlockSpec((None, 1, Wx), lambda n: (n, 0, 0)),
            pl.BlockSpec((F, fl), lambda n: (0, 0)),
            pl.BlockSpec((1, fl * F), lambda n: (0, 0)),
            pl.BlockSpec(memory_space=pltpu.MemorySpace.SMEM),
        ],
        out_specs=pl.BlockSpec((None, 1, Wo), lambda n: (n, 0, 0)),
        compiler_params=pltpu.CompilerParams(
            dimension_semantics=("parallel",)),
    )(xarr, w1f, w2f, a32)
    return y[:, :, :L2]                                                      # (N, 1, L2)


def wh_reference(x, w1, w2, a):
    """Pure-JAX reference matching torch Conv1d (cross-correlation) semantics."""
    p = w1.shape[-1] // 2
    dn = ("NCH", "OIH", "NCH")
    h = lax.conv_general_dilated(x, w1, (1,), [(p, p)], dimension_numbers=dn)
    z = a[0] * h + a[1] * h ** 2 + a[2] * h ** 3
    y = lax.conv_general_dilated(z, w2, (1,), [(p, p)], dimension_numbers=dn)
    return y


if __name__ == "__main__":
    N, L, fl, F = 2, 16, 5, 32          # batch, seq len, filter_length, num_filters

    key = jax.random.PRNGKey(0)
    k1, k2, kx = jax.random.split(key, 3)

    # Deterministic xavier_uniform_ init (same bounds PyTorch would use).
    b1 = float(np.sqrt(6.0 / (1 * fl + F * fl)))    # conv1.weight (F, 1, fl)
    b2 = float(np.sqrt(6.0 / (F * fl + 1 * fl)))    # conv2.weight (1, F, fl)
    w1 = jax.random.uniform(k1, (F, 1, fl), jnp.float32, -b1, b1)
    w2 = jax.random.uniform(k2, (1, F, fl), jnp.float32, -b2, b2)
    # Non-trivial WH nonlinearity coefficients (module default (0,0,0) would zero the output).
    a = jnp.array([1.0, 0.05, 0.01], jnp.float32)

    x = jax.random.normal(kx, (N, 1, L), jnp.float32)

    y = jax.block_until_ready(wh_channel_net(x, w1, w2, a))
    y_ref = wh_reference(x, w1, w2, a)

    assert y.shape == y_ref.shape == (N, 1, L)
    np.testing.assert_allclose(np.asarray(y), np.asarray(y_ref), rtol=1e-5, atol=1e-5)
    print("KERNEL_OK")
</pallas_src>

<mosaic_0001>
module attributes {stable_mosaic.version = 11 : i64} {
  func.func @_wh_kernel(%arg0: i32, %arg1: memref<1x1x384xf32, #tpu.memory_space<vmem>>, %arg2: memref<32x5xf32, #tpu.memory_space<vmem>>, %arg3: memref<1x160xf32, #tpu.memory_space<vmem>>, %arg4: memref<3xf32, #tpu.memory_space<smem>>, %arg5: memref<1x1x128xf32, #tpu.memory_space<vmem>>) attributes {dimension_semantics = [#tpu.dimension_semantics<parallel>], iteration_bounds = array<i64: 2>, scalar_prefetch = 0 : i64, scratch_operands = 0 : i64, tpu.core_type = #tpu.core_type<tc>, window_params = [{transform_indices = @transform_0, window_bounds = array<i64: 1, 1, 384>}, {pipeline_mode = #tpu.pipeline_mode<synchronous>, transform_indices = @transform_1, window_bounds = array<i64: 32, 5>}, {pipeline_mode = #tpu.pipeline_mode<synchronous>, transform_indices = @transform_2, window_bounds = array<i64: 1, 160>}, {transform_indices = @transform_3, window_bounds = array<i64: 3>}, {transform_indices = @transform_4, window_bounds = array<i64: 1, 1, 128>}]} {
    %c0 = arith.constant 0 : index
    %0 = memref.load %arg4[%c0] : memref<3xf32, #tpu.memory_space<smem>>
    %c1 = arith.constant 1 : index
    %1 = memref.load %arg4[%c1] : memref<3xf32, #tpu.memory_space<smem>>
    %c2 = arith.constant 2 : index
    %2 = memref.load %arg4[%c2] : memref<3xf32, #tpu.memory_space<smem>>
    %cst = arith.constant 0.000000e+00 : f32
    %3 = vector.broadcast %cst : f32 to vector<32x256xf32>
    %c0_0 = arith.constant 0 : index
    %c0_1 = arith.constant 0 : index
    %4 = vector.load %arg2[%c0_0, %c0_1] : memref<32x5xf32, #tpu.memory_space<vmem>>, vector<32x1xf32>
    %c0_2 = arith.constant 0 : index
    %c0_3 = arith.constant 0 : index
    %c0_4 = arith.constant 0 : index
    %5 = vector.load %arg1[%c0_2, %c0_3, %c0_4] : memref<1x1x384xf32, #tpu.memory_space<vmem>>, vector<1x1x256xf32>
    %6 = vector.shape_cast %5 : vector<1x1x256xf32> to vector<1x256xf32>
    %7 = vector.broadcast %4 : vector<32x1xf32> to vector<32x256xf32>
    %8 = vector.broadcast %6 : vector<1x256xf32> to vector<32x256xf32>
    %9 = arith.mulf %7, %8 : vector<32x256xf32>
    %10 = arith.addf %3, %9 : vector<32x256xf32>
    %c0_5 = arith.constant 0 : index
    %c1_6 = arith.constant 1 : index
    %11 = vector.load %arg2[%c0_5, %c1_6] : memref<32x5xf32, #tpu.memory_space<vmem>>, vector<32x1xf32>
    %c0_7 = arith.constant 0 : index
    %c0_8 = arith.constant 0 : index
    %c1_9 = arith.constant 1 : index
    %12 = vector.load %arg1[%c0_7, %c0_8, %c1_9] : memref<1x1x384xf32, #tpu.memory_space<vmem>>, vector<1x1x256xf32>
    %13 = vector.shape_cast %12 : vector<1x1x256xf32> to vector<1x256xf32>
    %14 = vector.broadcast %11 : vector<32x1xf32> to vector<32x256xf32>
    %15 = vector.broadcast %13 : vector<1x256xf32> to vector<32x256xf32>
    %16 = arith.mulf %14, %15 : vector<32x256xf32>
    %17 = arith.addf %10, %16 : vector<32x256xf32>
    %c0_10 = arith.constant 0 : index
    %c2_11 = arith.constant 2 : index
    %18 = vector.load %arg2[%c0_10, %c2_11] : memref<32x5xf32, #tpu.memory_space<vmem>>, vector<32x1xf32>
    %c0_12 = arith.constant 0 : index
    %c0_13 = arith.constant 0 : index
    %c2_14 = arith.constant 2 : index
    %19 = vector.load %arg1[%c0_12, %c0_13, %c2_14] : memref<1x1x384xf32, #tpu.memory_space<vmem>>, vector<1x1x256xf32>
    %20 = vector.shape_cast %19 : vector<1x1x256xf32> to vector<1x256xf32>
    %21 = vector.broadcast %18 : vector<32x1xf32> to vector<32x256xf32>
    %22 = vector.broadcast %20 : vector<1x256xf32> to vector<32x256xf32>
    %23 = arith.mulf %21, %22 : vector<32x256xf32>
    %24 = arith.addf %17, %23 : vector<32x256xf32>
    %c0_15 = arith.constant 0 : index
    %c3 = arith.constant 3 : index
    %25 = vector.load %arg2[%c0_15, %c3] : memref<32x5xf32, #tpu.memory_space<vmem>>, vector<32x1xf32>
    %c0_16 = arith.constant 0 : index
    %c0_17 = arith.constant 0 : index
    %c3_18 = arith.constant 3 : index
    %26 = vector.load %arg1[%c0_16, %c0_17, %c3_18] : memref<1x1x384xf32, #tpu.memory_space<vmem>>, vector<1x1x256xf32>
    %27 = vector.shape_cast %26 : vector<1x1x256xf32> to vector<1x256xf32>
    %28 = vector.broadcast %25 : vector<32x1xf32> to vector<32x256xf32>
    %29 = vector.broadcast %27 : vector<1x256xf32> to vector<32x256xf32>
    %30 = arith.mulf %28, %29 : vector<32x256xf32>
    %31 = arith.addf %24, %30 : vector<32x256xf32>
    %c0_19 = arith.constant 0 : index
    %c4 = arith.constant 4 : index
    %32 = vector.load %arg2[%c0_19, %c4] : memref<32x5xf32, #tpu.memory_space<vmem>>, vector<32x1xf32>
    %c0_20 = arith.constant 0 : index
    %c0_21 = arith.constant 0 : index
    %c4_22 = arith.constant 4 : index
    %33 = vector.load %arg1[%c0_20, %c0_21, %c4_22] : memref<1x1x384xf32, #tpu.memory_space<vmem>>, vector<1x1x256xf32>
    %34 = vector.shape_cast %33 : vector<1x1x256xf32> to vector<1x256xf32>
    %35 = vector.broadcast %32 : vector<32x1xf32> to vector<32x256xf32>
    %36 = vector.broadcast %34 : vector<1x256xf32> to vector<32x256xf32>
    %37 = arith.mulf %35, %36 : vector<32x256xf32>
    %38 = arith.addf %31, %37 : vector<32x256xf32>
    %39 = tpu.iota {dimensions = array<i32: 1>} : vector<1x256xi32>
    %c2_i32 = arith.constant 2 : i32
    %40 = vector.broadcast %c2_i32 : i32 to vector<1x256xi32>
    %41 = arith.cmpi sge, %39, %40 : vector<1x256xi32>
    %c18_i32 = arith.constant 18 : i32
    %42 = vector.broadcast %c18_i32 : i32 to vector<1x256xi32>
    %43 = arith.cmpi slt, %39, %42 : vector<1x256xi32>
    %44 = arith.andi %41, %43 : vector<1x256xi1>
    %cst_23 = arith.constant 0.000000e+00 : f32
    %45 = vector.shape_cast %44 : vector<1x256xi1> to vector<1x256xi1>
    %46 = vector.broadcast %45 : vector<1x256xi1> to vector<32x256xi1>
    %47 = vector.broadcast %cst_23 : f32 to vector<32x256xf32>
    %48 = arith.select %46, %38, %47 : vector<32x256xi1>, vector<32x256xf32>
    %49 = vector.broadcast %2 : f32 to vector<32x256xf32>
    %50 = arith.mulf %49, %48 : vector<32x256xf32>
    %51 = vector.broadcast %1 : f32 to vector<32x256xf32>
    %52 = arith.addf %51, %50 : vector<32x256xf32>
    %53 = arith.mulf %48, %52 : vector<32x256xf32>
    %54 = vector.broadcast %0 : f32 to vector<32x256xf32>
    %55 = arith.addf %54, %53 : vector<32x256xf32>
    %56 = arith.mulf %48, %55 : vector<32x256xf32>
    %57 = vector.extract_strided_slice %56 {offsets = [0, 0], sizes = [32, 128], strides = [1, 1]} : vector<32x256xf32> to vector<32x128xf32>
    %58 = vector.extract_strided_slice %56 {offsets = [0, 1], sizes = [32, 128], strides = [1, 1]} : vector<32x256xf32> to vector<32x128xf32>
    %59 = vector.extract_strided_slice %56 {offsets = [0, 2], sizes = [32, 128], strides = [1, 1]} : vector<32x256xf32> to vector<32x128xf32>
    %60 = vector.extract_strided_slice %56 {offsets = [0, 3], sizes = [32, 128], strides = [1, 1]} : vector<32x256xf32> to vector<32x128xf32>
    %61 = vector.extract_strided_slice %56 {offsets = [0, 4], sizes = [32, 128], strides = [1, 1]} : vector<32x256xf32> to vector<32x128xf32>
    %62 = tpu.concatenate %57, %58, %59, %60, %61 in 0 : vector<32x128xf32>, vector<32x128xf32>, vector<32x128xf32>, vector<32x128xf32>, vector<32x128xf32> -> vector<160x128xf32>
    %c0_24 = arith.constant 0 : index
    %c0_25 = arith.constant 0 : index
    %63 = vector.load %arg3[%c0_24, %c0_25] : memref<1x160xf32, #tpu.memory_space<vmem>>, vector<1x160xf32>
    %cst_26 = arith.constant dense<0.000000e+00> : vector<1x128xf32>
    %64 = tpu.matmul %63, %62, %cst_26 {dimension_numbers = #tpu.dot_dimension_numbers<[1], [0], [0], [1], [0, 0, 1, 1], [], []>} : vector<1x160xf32>, vector<160x128xf32>, vector<1x128xf32> -> vector<1x128xf32>
    %c0_27 = arith.constant 0 : index
    %c0_28 = arith.constant 0 : index
    %c0_29 = arith.constant 0 : index
    %65 = vector.load %arg5[%c0_27, %c0_28, %c0_29] : memref<1x1x128xf32, #tpu.memory_space<vmem>>, vector<1x1x128xf32>
    %66 = vector.shape_cast %65 : vector<1x1x128xf32> to vector<1x128xf32>
    %67 = vector.shape_cast %64 : vector<1x128xf32> to vector<1x1x128xf32>
    tpu.vector_store %arg5[%c0_27, %c0_28, %c0_29], %67 {strides = array<i32>} : memref<1x1x128xf32, #tpu.memory_space<vmem>>, vector<1x1x128xf32>,
    return
  }
  func.func @transform_0(%arg0: i32) -> (i32, i32, i32) {
    %c0_i32 = arith.constant 0 : i32
    %c0_i32_0 = arith.constant 0 : i32
    %c0_i32_1 = arith.constant 0 : i32
    return %arg0, %c0_i32, %c0_i32_0 : i32, i32, i32
  }
  func.func @transform_1(%arg0: i32) -> (i32, i32) {
    %c0_i32 = arith.constant 0 : i32
    %c0_i32_0 = arith.constant 0 : i32
    %c0_i32_1 = arith.constant 0 : i32
    return %c0_i32, %c0_i32_0 : i32, i32
  }
  func.func @transform_2(%arg0: i32) -> (i32, i32) {
    %c0_i32 = arith.constant 0 : i32
    %c0_i32_0 = arith.constant 0 : i32
    %c0_i32_1 = arith.constant 0 : i32
    return %c0_i32, %c0_i32_0 : i32, i32
  }
  func.func @transform_3(%arg0: i32) -> i32 {
    %c0_i32 = arith.constant 0 : i32
    %c0_i32_0 = arith.constant 0 : i32
    return %c0_i32 : i32
  }
  func.func @transform_4(%arg0: i32) -> (i32, i32, i32) {
    %c0_i32 = arith.constant 0 : i32
    %c0_i32_0 = arith.constant 0 : i32
    %c0_i32_1 = arith.constant 0 : i32
    return %arg0, %c0_i32, %c0_i32_0 : i32, i32, i32
  }
}

</mosaic_0001>

<bundles_post_ra>
// kernel: tpu_custom_call.1
= control target key start
LH: loop header
LB: loop body
LE: loop exit
PB: predicated region body
PF: predicated region fallthrough
CT: control target
= control target key end

     0   :  { %9 = vsyncpa [#allocation4], 0  ;;  %s1610_s0 = inlined_call_operand.vmem [shape: f32[2,1,384], index: 0, kind: input, shape index: {}]   ;;  %s1611_s1 = inlined_call_operand.vmem [shape: f32[32,5], index: 1, kind: input, shape index: {}]   ;;  %s1612_s2 = inlined_call_operand.vmem [shape: f32[1,160], index: 2, kind: input, shape index: {}]   ;;  %s1613_s3 = inlined_call_operand.vmem [shape: f32[3], index: 3, kind: input, shape index: {}]   ;;  %s1614_s4 = inlined_call_operand.hbm [shape: f32[2,1,128], index: 4, kind: output, shape index: {}]  }
   0x1   :  { %10 = vsyncpa [#allocation3], 0 }
   0x2   :  { %12 = vsyncpa [#allocation3 + $0x1], 0  ;;  %s1284_s15 = smov 0   ;;  %s1286_s16 = smov 0  }
   0x3   :  { %s1288_s17 = smov 0   ;;  %s1290_s18 = smov 0  }
   0x4 LB: > { %s1305_s19 = sadd.s32 4294967295, %s1245_s18   ;;  %s967_s20 = sadd.s32 4294967294, %s1245_s18   ;;  %s1245_s18 = sphi %s1290_s18, %s1623_s18   ;;  %s1241_s17 = sphi %s1288_s17, %s1622_s17   ;;  %s1237_s16 = sphi %s1286_s16, %s1621_s16   ;;  %s1233_s15 = sphi %s1284_s15, %s1620_s15  }
   0x5   : > { %s1309_s21 = sadd.s32 1, %s1245_s18   ;;  %s114_s22 = sadd.s32 1, %s1241_s17 }
   0x6   : > { %s111_s23 = ssub.s32 %s1245_s18, %s1309_s21  ;;  %p124_p0 = scmp.ne.s32.totalorder %s1241_s17, %s1237_s16 }
   0x7   : > { %p112_p1 = scmp.eq.s32.totalorder %s111_s23, 0  ;;  %p125_p2 = scmp.eq.s32.totalorder %s1305_s19, 1 }
   0x8   : > { %p130_p3 = scmp.ne.s32.totalorder %s1237_s16, %s1233_s15  ;;  %p131_p4 = scmp.eq.s32.totalorder %s967_s20, 1 }
   0x9   : > { %s1320_s24 = scalar_select %p112_p1, %s1241_s17, %s114_s22  }
   0xa   : > { %p1322_p5 = por %p125_p2, %p124_p0  ;;  %p1326_p6 = por %p131_p4, %p130_p3 }
   0xb   : > { %p968_p7 = scmp.ge.s32.totalorder %s1245_s18, 1  ;;  %p138_p8 = scmp.lt.s32.totalorder %s1245_s18, 3 }
   0xc   : > { %p1024_p9 = scmp.eq.s32.totalorder %s1305_s19, 0  ;;  %s157_s30 = sshll.u32 %s1613_s3, 4  ;;  %s158_s30 = int_to_ptr.vmem [resolvable:$true] %s157_s30 }
   0xd   : > { %p1333_p10 = pnand %p968_p7, %p138_p8  ;;  %s1164_s5 = scalar_lea.vmem %s158_s30, 16 }
   0xe   : > { %p1165_p13 = scmp.ne.s32.totalorder %s158_s30, %s1164_s5  ;;  %p1172_p3 = scmp.lt.s32.totalorder %s158_s30, %s158_s30 }
   0xf   : > { %p1016_p11 = pneg %p1333_p10  ;;  %p1173_p4 = scmp.lt.s32.totalorder %s1164_s5, %s1164_s5 }
  0x11   : > { %p1017_p12 = pnand %p1024_p9, %p1016_p11  ;;  %p1174_p7 = por %p1173_p4, %p1172_p3 }
  0x13   : > { %p1166_p0 = pneg %p1017_p12 }
  0x15   : > { %p1167_p1 = pnand %p1166_p0, %p1165_p13 }
  0x17   : > { %p1168_p2 = pneg %p1167_p1 }
  0x19   : > { %p1175_p8 = pnand %p1174_p7, %p1168_p2 }
  0x1b   : > { %1178 = shalt.err (!%p1175_p8)
}
  0x1c   : > { %s1247_s6 = smov [#allocation2]   ;;  %177 = sbr.rel (%p1333_p10) target bundleno = 734 (0x2de), region = 36 }
  0x1d   : > { %1019 = dma.vmem_to_smem (!%p1017_p12), %s158_s30, 16, %s1247_s6, [#allocation4]  }
  0x23   : > { %1224 = dma.done.wait (%p1024_p9), [#allocation4], 16  }
  0x24   : > { %1226 = vsyncadd (%p1024_p9), [#allocation4], 4294967280 }
  0x25   : > { %183 = sfence }
  0x26   : > { %v209_v0 = vld [vmem:[%s1611_s1] sm:$0xff]  ;;  %v1248_v1 = vmov 1   ;;  %v1249_v2 = vmov 2   ;;  %v210_v3 = vld [vmem:[%s1611_s1 + $0x8] sm:$0xff]  ;;  %v211_v4 = vld [vmem:[%s1611_s1 + $0x10] sm:$0xff]  ;;  %v1250_v6 = vmov 3   ;;  %v235_v9 = vlaneseq }
  0x27   : > { %1070 = vset.pattern.permute.xlu0 %v1248_v1  ;;  %1071 = vset.pattern.permute.xlu1 %v1249_v2  ;;  %v212_v5 = vld [vmem:[%s1611_s1 + $0x18] sm:$0xff]  ;;  %v1251_v7 = vmov 4   ;;  %v1252_v8 = vmov 0   ;;  %p202_p9 = scmp.lt.s32.totalorder %s1305_s19, 1  ;;  %s1253_s29 = smov 127   ;;  %v1257_v56 = vmov 0.0|0.0  }
  0x28   : > { %263 = vperm.xlu0 %1070, %v209_v0   ;;  %368 = vperm.xlu1 %1071, %v209_v0   ;;  %v1365_v10 = vshrl.u32 %v235_v9, 7  ;;  %s1254_s30 = smov 126   ;;  %s1255_s5 = smov 125   ;;  %vm342_vm0 = vcmask 1039360   ;;  %vm431_vm1 = vcmask 1031168   ;;  %vm520_vm2 = vcmask 1022976  }
  0x29   : > { %s203_s20 = scalar_select %p202_p9, %s1305_s19, 1  ;;  %979 = vmatprep.subr.bf16.mxu0 %v1257_v56  ;;  %vm609_vm3 = vcmask 1014784   ;;  %vm813_vm7 = vcmask 261120  }
  0x2a   : > { %v1373_v11 = vsub.s32 0, %v1365_v10  ;;  %v285_v12 = vsub.s32 1, %v1365_v10  ;;  %s1256_s6 = smov 124   ;;  %s974_s7 = sld [smem:[#allocation2 + $0x2]] }
  0x2b   : > { %s1009_s22 = smul.u32 3, %s203_s20  ;;  %s973_s8 = sld [smem:[#allocation2 + $0x1]] }
  0x2c   : > { %267 = vperm.xlu0 %1070, %v210_v3   ;;  %372 = vperm.xlu1 %1071, %v210_v3   ;;  %s206_s9 = sld [smem:[#allocation2]]  ;;  %s200_s12 = sand.u32 1, %s1237_s16  }
  0x2d   : > { %s1370_s28 = scalar_lea.vmem %s1610_s0, %s1009_s22  ;;  %s201_s13 = scalar_lea.vmem [#allocation5], %s200_s12 }
  0x2e   : > { %v261_v13 = vld [vmem:[%s1370_s28] sm:$0x7]  ;;  %s900_s14 = sshll.u32 %s201_s13, 4  ;;  %s976_s20 = sshll.u32 %s1305_s19, 4  ;;  %s1565_s14 = int_to_ptr.vmem [resolvable:$true] %s900_s14 }
  0x2f   : > { %v1378_v14 = vrot.slane %v261_v13, %v1373_v11  ;;  %v1382_v15 = vrot.slane %v261_v13, %v285_v12  ;;  %s1570_s27 = scalar_lea.hbm %s1614_s4, %s976_s20  ;;  %s1258_s19 = smov [#allocation5]  }
  0x30   : > { %271 = vperm.xlu0 %1070, %v211_v4   ;;  %1072 = vset.pattern.permute.xlu1 %v1248_v1 }
  0x31   : > { %275 = vperm.xlu1 %1072, %v212_v5  }
  0x34   : > { %1075 = vset.pattern.permute.xlu0 %v1249_v2 }
  0x35   : > { %380 = vperm.xlu0 %1075, %v212_v5   ;;  %1073 = vset.pattern.permute.xlu1 %v1250_v6 }
  0x36   : > { %461 = vperm.xlu1 %1073, %v210_v3  }
  0x39   : > { %1076 = vset.pattern.permute.xlu0 %v1250_v6 }
  0x3a   : > { %457 = vperm.xlu0 %1076, %v209_v0   ;;  %1074 = vset.pattern.permute.xlu1 %v1249_v2 }
  0x3b   : > { %376 = vperm.xlu1 %1074, %v211_v4  }
  0x3e   : > { %465 = vperm.xlu0 %1076, %v211_v4  }
  0x3f   : > { %1077 = vset.pattern.permute.xlu1 %v1251_v7 }
  0x40   : > { %546 = vperm.xlu1 %1077, %v209_v0  }
  0x42   : > { %1080 = vset.pattern.permute.xlu0 %v1251_v7 }
  0x43   : > { %558 = vperm.xlu0 %1080, %v212_v5  }
  0x44   : > { %550 = vperm.xlu1 %1077, %v210_v3  }
  0x47   : > { %1082 = vset.pattern.permute.xlu0 %v1252_v8 }
  0x48   : > { %1078 = vset.pattern.permute.xlu1 %v1250_v6  ;;  %226 = vperm.xlu0 %1082, %v211_v4  }
  0x49   : > { %469 = vperm.xlu1 %1078, %v212_v5  }
  0x4c   : > { %1163 = vset.pattern.permute.xlu0 %v1251_v7 }
  0x4d   : > { %1079 = vset.pattern.permute.xlu1 %v1251_v7 }
  0x4e   : > { %554 = vperm.xlu1 %1079, %v211_v4  }
  0x52   : > { %1081 = vset.pattern.permute.xlu1 %v1252_v8 }
  0x53   : > { %216 = vperm.xlu1 %1081, %v209_v0  }
  0x57   : > { %221 = vperm.xlu1 %1081, %v210_v3  }
  0x5b   : > { %231 = vperm.xlu1 %1081, %v212_v5  }
  0xa7   : > { %v264_v16 = vpop.permute.xlu0 %263  ;;  %v369_v19 = vpop.permute.xlu1 %368 }
  0xa8   : > { %v294_v17 = vmul.f32 %v1378_v14, %v264_v16  ;;  %v295_v18 = vmul.f32 %v1382_v15, %v264_v16  ;;  %v383_v23 = vmul.f32 %v369_v19, %v1378_v14  ;;  %v384_v24 = vmul.f32 %v369_v19, %v1382_v15 }
  0xaa   : > { %320 = vrot.lane.b32.xlu0 %v295_v18, %s1253_s29  ;;  %318 = vrot.lane.b32.xlu1 %v294_v17, %s1253_s29 }
  0xab   : > { %v268_v20 = vpop.permute.xlu0 %267  ;;  %v373_v25 = vpop.permute.xlu1 %372 }
  0xac   : > { %v297_v21 = vmul.f32 %v1378_v14, %v268_v20  ;;  %v298_v22 = vmul.f32 %v1382_v15, %v268_v20  ;;  %v386_v27 = vmul.f32 %v373_v25, %v1378_v14  ;;  %v387_v28 = vmul.f32 %v373_v25, %v1382_v15 }
  0xae   : > { %326 = vrot.lane.b32.xlu0 %v298_v22, %s1253_s29  ;;  %324 = vrot.lane.b32.xlu1 %v297_v21, %s1253_s29 }
  0xaf   : > { %v272_v26 = vpop.permute.xlu0 %271 }
  0xb0   : > { %v276_v30 = vpop.permute.xlu1 %275  ;;  %v300_v31 = vmul.f32 %v1378_v14, %v272_v26  ;;  %v301_v32 = vmul.f32 %v1382_v15, %v272_v26 }
  0xb1   : > { %v303_v33 = vmul.f32 %v1378_v14, %v276_v30  ;;  %v304_v34 = vmul.f32 %v1382_v15, %v276_v30 }
  0xb2   : > { %409 = vrot.lane.b32.xlu0 %v384_v24, %s1254_s30  ;;  %407 = vrot.lane.b32.xlu1 %v383_v23, %s1254_s30  ;;  %v213_v23 = vld [vmem:[%s1370_s28] sm:$0x3]  ;;  %s888_s28 = scalar_lea.sflag [#allocation3], %s200_s12 }
  0xb3   : > { %v1459_v26 = vrot.slane %v213_v23, %v1373_v11 }
  0xb4   : > { %v381_v29 = vpop.permute.xlu0 %380 }
  0xb5   : > { %v462_v36 = vpop.permute.xlu1 %461  ;;  %v392_v45 = vmul.f32 %v381_v29, %v1378_v14  ;;  %v393_v46 = vmul.f32 %v381_v29, %v1382_v15  ;;  %v1461_v29 = vstv %s974_s7 }
  0xb6   : > { %415 = vrot.lane.b32.xlu0 %v387_v28, %s1254_s30  ;;  %413 = vrot.lane.b32.xlu1 %v386_v27, %s1254_s30  ;;  %v475_v39 = vmul.f32 %v462_v36, %v1378_v14  ;;  %v476_v40 = vmul.f32 %v462_v36, %v1382_v15 }
  0xb9   : > { %v458_v35 = vpop.permute.xlu0 %457 }
  0xba   : > { %332 = vrot.lane.b32.xlu0 %v301_v32, %s1253_s29  ;;  %330 = vrot.lane.b32.xlu1 %v300_v31, %s1253_s29  ;;  %v472_v37 = vmul.f32 %v458_v35, %v1378_v14  ;;  %v473_v38 = vmul.f32 %v458_v35, %v1382_v15  ;;  %v377_v41 = vpop.permute.xlu1 %376  ;;  %v635_v32 = vand.u32 127, %v235_v9 }
  0xbb   : > { %v389_v42 = vmul.f32 %v377_v41, %v1378_v14  ;;  %v390_v43 = vmul.f32 %v377_v41, %v1382_v15 }
  0xbc   : > { %vm637_vm4 = vcmp.ge.s32.totalorder %v635_v32, 2  ;;  %vm639_vm5 = vcmp.lt.s32.totalorder %v635_v32, 18 }
  0xbd   : > { %v466_v52 = vpop.permute.xlu0 %465  ;;  %vm1476_vm6 = vmand %vm637_vm4, %vm639_vm5 }
  0xbe   : > { %338 = vrot.lane.b32.xlu0 %v304_v34, %s1253_s29  ;;  %336 = vrot.lane.b32.xlu1 %v303_v33, %s1253_s29  ;;  %v478_v54 = vmul.f32 %v466_v52, %v1378_v14  ;;  %v479_v55 = vmul.f32 %v466_v52, %v1382_v15  ;;  %v657_v34 = vmul.f32 0.0, %v1461_v29 }
  0xbf   : > { %v547_v44 = vpop.permute.xlu1 %546 }
  0xc0   : > { %v561_v47 = vmul.f32 %v547_v44, %v1378_v14  ;;  %v562_v48 = vmul.f32 %v547_v44, %v1382_v15 }
  0xc2   : > { %498 = vrot.lane.b32.xlu0 %v473_v38, %s1255_s5  ;;  %496 = vrot.lane.b32.xlu1 %v472_v37, %s1255_s5  ;;  %v559_v62 = vpop.permute.xlu0 %558  ;;  %v1468_v38 = vstv %s973_s8 }
  0xc3   : > { %v551_v49 = vpop.permute.xlu1 %550  ;;  %v570_v63 = vmul.f32 %v559_v62, %v1378_v14  ;;  %v571_v0 = vmul.f32 %v559_v62, %v1382_v15 }
  0xc4   : > { %v564_v50 = vmul.f32 %v551_v49, %v1378_v14  ;;  %v565_v51 = vmul.f32 %v551_v49, %v1382_v15 }
  0xc6   : > { %504 = vrot.lane.b32.xlu0 %v476_v40, %s1255_s5  ;;  %502 = vrot.lane.b32.xlu1 %v475_v39, %s1255_s5 }
  0xc7   : > { %v1449_v3 = vpop.permute.xlu0 %226 }
  0xc8   : > { %v470_v53 = vpop.permute.xlu1 %469 }
  0xc9   : > { %v481_v57 = vmul.f32 %v470_v53, %v1378_v14  ;;  %v482_v58 = vmul.f32 %v470_v53, %v1382_v15 }
  0xca   : > { %421 = vrot.lane.b32.xlu0 %v390_v43, %s1254_s30  ;;  %419 = vrot.lane.b32.xlu1 %v389_v42, %s1254_s30  ;;  %v666_v43 = vadd.f32 %v1468_v38, %v657_v34 }
  0xcc   : > { %v674_v53 = vmul.f32 0.0, %v666_v43 }
  0xcd   : > { %v555_v59 = vpop.permute.xlu1 %554 }
  0xce   : > { %427 = vrot.lane.b32.xlu0 %v393_v46, %s1254_s30  ;;  %425 = vrot.lane.b32.xlu1 %v392_v45, %s1254_s30  ;;  %v567_v60 = vmul.f32 %v555_v59, %v1378_v14  ;;  %v568_v61 = vmul.f32 %v555_v59, %v1382_v15 }
  0xd2   : > { %587 = vrot.lane.b32.xlu0 %v562_v48, %s1256_s6  ;;  %585 = vrot.lane.b32.xlu1 %v561_v47, %s1256_s6  ;;  %v217_v1 = vpop.permute.xlu1 %216 }
  0xd3   : > { %v245_v31 = vmul.f32 %v1459_v26, %v217_v1 }
  0xd6   : > { %593 = vrot.lane.b32.xlu0 %v565_v51, %s1256_s6  ;;  %591 = vrot.lane.b32.xlu1 %v564_v50, %s1256_s6  ;;  %v222_v2 = vpop.permute.xlu1 %221 }
  0xd7   : > { %v247_v41 = vmul.f32 %v1459_v26, %v222_v2 }
  0xda   : > { %510 = vrot.lane.b32.xlu0 %v479_v55, %s1255_s5  ;;  %508 = vrot.lane.b32.xlu1 %v478_v54, %s1255_s5  ;;  %v1451_v4 = vpop.permute.xlu1 %231  ;;  %v681_v55 = vstv %s206_s9 }
  0xde   : > { %516 = vrot.lane.b32.xlu0 %v482_v58, %s1255_s5  ;;  %514 = vrot.lane.b32.xlu1 %v481_v57, %s1255_s5 }
  0xe2   : > { %599 = vrot.lane.b32.xlu0 %v568_v61, %s1256_s6  ;;  %597 = vrot.lane.b32.xlu1 %v567_v60, %s1256_s6 }
  0xe6   : > { %605 = vrot.lane.b32.xlu0 %v571_v0, %s1256_s6  ;;  %603 = vrot.lane.b32.xlu1 %v570_v63, %s1256_s6  ;;  %v683_v63 = vadd.f32 %v681_v55, %v674_v53 }
 0x11c   : > { %v321_v5 = vpop.permute.xlu0 %320  ;;  %v319_v6 = vpop.permute.xlu1 %318 }
 0x11d   : > { %v343_v30 = vsel %vm342_vm0, %v319_v6, %v321_v5 }
 0x11e   : > { %v359_v35 = vadd.f32 %v343_v30, %v245_v31 }
 0x120   : > { %v327_v7 = vpop.permute.xlu0 %326  ;;  %v325_v8 = vpop.permute.xlu1 %324 }
 0x121   : > { %v345_v39 = vsel %vm342_vm0, %v325_v8, %v327_v7 }
 0x122   : > { %v361_v44 = vadd.f32 %v345_v39, %v247_v41 }
 0x124   : > { %v410_v13 = vpop.permute.xlu0 %409  ;;  %v408_v16 = vpop.permute.xlu1 %407 }
 0x125   : > { %v432_v33 = vsel %vm431_vm1, %v408_v16, %v410_v13  ;;  %v249_v13 = vmul.f32 %v1459_v26, %v1449_v3  ;;  %v251_v3 = vmul.f32 %v1459_v26, %v1451_v4 }
 0x126   : > { %v448_v42 = vadd.f32 %v432_v33, %v359_v35 }
 0x128   : > { %v416_v14 = vpop.permute.xlu0 %415  ;;  %v414_v17 = vpop.permute.xlu1 %413 }
 0x129   : > { %v434_v9 = vsel %vm431_vm1, %v414_v17, %v416_v14  ;;  %v691_v14 = vmul.f32 0.0, %v683_v63 }
 0x12a   : > { %v450_v51 = vadd.f32 %v434_v9, %v361_v44 }
 0x12c   : > { %v333_v15 = vpop.permute.xlu0 %332  ;;  %v331_v18 = vpop.permute.xlu1 %330 }
 0x12d   : > { %v347_v6 = vsel %vm342_vm0, %v331_v18, %v333_v15 }
 0x130   : > { %v1453_v19 = vpop.permute.xlu0 %338  ;;  %v1455_v20 = vpop.permute.xlu1 %336 }
 0x134   : > { %v499_v21 = vpop.permute.xlu0 %498  ;;  %v497_v22 = vpop.permute.xlu1 %496 }
 0x135   : > { %v521_v40 = vsel %vm520_vm2, %v497_v22, %v499_v21  ;;  %v363_v22 = vadd.f32 %v347_v6, %v249_v13 }
 0x136   : > { %v537_v45 = vadd.f32 %v521_v40, %v448_v42 }
 0x138   : > { %v505_v24 = vpop.permute.xlu0 %504  ;;  %v503_v25 = vpop.permute.xlu1 %502 }
 0x139   : > { %v523_v48 = vsel %vm520_vm2, %v503_v25, %v505_v24  ;;  %v349_v25 = vsel %vm342_vm0, %v1455_v20, %v1453_v19 }
 0x13a   : > { %v539_v54 = vadd.f32 %v523_v48, %v450_v51  ;;  %v365_v33 = vadd.f32 %v349_v25, %v251_v3 }
 0x13c   : > { %v422_v27 = vpop.permute.xlu0 %421  ;;  %v420_v28 = vpop.permute.xlu1 %419 }
 0x13d   : > { %v436_v16 = vsel %vm431_vm1, %v420_v28, %v422_v27 }
 0x13e   : > { %v452_v31 = vadd.f32 %v436_v16, %v363_v22 }
 0x140   : > { %v428_v36 = vpop.permute.xlu0 %427  ;;  %v426_v37 = vpop.permute.xlu1 %425 }
 0x141   : > { %v438_v27 = vsel %vm431_vm1, %v426_v37, %v428_v36 }
 0x142   : > { %v454_v20 = vadd.f32 %v438_v27, %v365_v33 }
 0x144   : > { %v588_v46 = vpop.permute.xlu0 %587  ;;  %v586_v47 = vpop.permute.xlu1 %585 }
 0x145   : > { %v610_v50 = vsel %vm609_vm3, %v586_v47, %v588_v46 }
 0x146   : > { %v626_v52 = vadd.f32 %v610_v50, %v537_v45 }
 0x148   : > { %v647_v57 = vsel %vm1476_vm6, %v626_v52, 0.0  ;;  %v594_v58 = vpop.permute.xlu0 %593  ;;  %v592_v59 = vpop.permute.xlu1 %591 }
 0x149   : > { %v656_v60 = vmul.f32 %v1461_v29, %v647_v57  ;;  %v612_v61 = vsel %vm609_vm3, %v592_v59, %v594_v58 }
 0x14a   : > { %v628_v62 = vadd.f32 %v612_v61, %v539_v54 }
 0x14b   : > { %v665_v0 = vadd.f32 %v1468_v38, %v656_v60 }
 0x14c   : > { %v649_v1 = vsel %vm1476_vm6, %v628_v62, 0.0  ;;  %v511_v2 = vpop.permute.xlu0 %510  ;;  %v509_v5 = vpop.permute.xlu1 %508 }
 0x14d   : > { %v673_v7 = vmul.f32 %v665_v0, %v647_v57  ;;  %v658_v8 = vmul.f32 %v1461_v29, %v649_v1  ;;  %v525_v30 = vsel %vm520_vm2, %v509_v5, %v511_v2 }
 0x14e   : > { %v541_v34 = vadd.f32 %v525_v30, %v452_v31 }
 0x14f   : > { %v682_v17 = vadd.f32 %v681_v55, %v673_v7  ;;  %v667_v21 = vadd.f32 %v1468_v38, %v658_v8 }
 0x150   : > { %v517_v23 = vpop.permute.xlu0 %516  ;;  %v515_v24 = vpop.permute.xlu1 %514 }
 0x151   : > { %v690_v15 = vmul.f32 %v682_v17, %v647_v57  ;;  %v675_v18 = vmul.f32 %v667_v21, %v649_v1  ;;  %v527_v41 = vsel %vm520_vm2, %v515_v24, %v517_v23 }
 0x152   : > { %v543_v26 = vadd.f32 %v527_v41, %v454_v20 }
 0x153   : > { %v684_v28 = vadd.f32 %v681_v55, %v675_v18  ;;  %v1083_v32 = vpack.i.bf16 %v691_v14, %v690_v15 }
 0x154   : > { %v600_v35 = vpop.permute.xlu0 %599  ;;  %v598_v39 = vpop.permute.xlu1 %597 }
 0x155   : > { %v692_v40 = vmul.f32 %v684_v28, %v649_v1  ;;  %v614_v19 = vsel %vm609_vm3, %v598_v39, %v600_v35  ;;  %1084 = vrot.lane.b32.xlu1 %v1083_v32, %s1253_s29 }
 0x156   : > { %v630_v42 = vadd.f32 %v614_v19, %v541_v34 }
 0x157   : > { %v1088_v9 = vpack.i.bf16 %v691_v14, %v692_v40  ;;  %v980_v4 = vpack.c.bf16 %v692_v40, %v690_v15 }
 0x158   : > { %v651_v36 = vsel %vm1476_vm6, %v630_v42, 0.0  ;;  %v606_v37 = vpop.permute.xlu0 %605  ;;  %v604_v43 = vpop.permute.xlu1 %603 }
 0x159   : > { %v660_v44 = vmul.f32 %v1461_v29, %v651_v36  ;;  %v616_v45 = vsel %vm609_vm3, %v604_v43, %v606_v37  ;;  %1089 = vrot.lane.b32.xlu0 %v1088_v9, %s1253_s29  ;;  %981 = vmatpush1.bf16.msra.mxu0 %v980_v4 }
 0x15a   : > { %v632_v46 = vadd.f32 %v616_v45, %v543_v26  ;;  %982 = vmatprep.subr.bf16.mxu0 %v1257_v56 }
 0x15b   : > { %v669_v47 = vadd.f32 %v1468_v38, %v660_v44 }
 0x15c   : > { %v653_v48 = vsel %vm1476_vm6, %v632_v46, 0.0 }
 0x15d   : > { %v677_v50 = vmul.f32 %v669_v47, %v651_v36  ;;  %v662_v51 = vmul.f32 %v1461_v29, %v653_v48  ;;  %v1530_v29 = vld [vmem:[%s1612_s2] sm:$0x3] }
 0x15f   : > { %v686_v52 = vadd.f32 %v681_v55, %v677_v50  ;;  %v671_v53 = vadd.f32 %v1468_v38, %v662_v51  ;;  %v811_v38 = vrot.slane %v1530_v29, %v285_v12 }
 0x161   : > { %v694_v54 = vmul.f32 %v686_v52, %v651_v36  ;;  %v679_v57 = vmul.f32 %v671_v53, %v653_v48  ;;  %975 = vmatprep.mubr.msk.f32.mxu0 %vm813_vm7, %v811_v38 }
 0x163   : > { %v688_v58 = vadd.f32 %v681_v55, %v679_v57  ;;  %v1093_v59 = vpack.i.bf16 %v691_v14, %v694_v54 }
 0x165   : > { %v696_v60 = vmul.f32 %v688_v58, %v653_v48  ;;  %1094 = vrot.lane.b32.xlu1 %v1093_v59, %s1253_s29 }
 0x167   : > { %v1098_v61 = vpack.i.bf16 %v691_v14, %v696_v60  ;;  %v983_v62 = vpack.c.bf16 %v696_v60, %v694_v54 }
 0x169   : > { %1099 = vrot.lane.b32.xlu0 %v1098_v61, %s1253_s29  ;;  %1104 = vrot.lane.b32.xlu1 %v1083_v32, %s1254_s30  ;;  %s1179_s29 = scalar_lea.vmem %s1565_s14, 16 }
 0x16a   : > { %984 = vmatpush1.bf16.msra.mxu0 %v983_v62  ;;  %p1180_p10 = scmp.ne.s32.totalorder %s1565_s14, %s1179_s29 }
 0x16b   : > { %985 = vmatprep.subr.bf16.mxu0 %v1257_v56 }
 0x16c   : > { %p1181_p11 = pnand %p1180_p10, %p1322_p5 }
 0x16d   : > { %1109 = vrot.lane.b32.xlu0 %v1088_v9, %s1254_s30  ;;  %1114 = vrot.lane.b32.xlu1 %v1093_v59, %s1254_s30 }
 0x16e   : > { %p1182_p12 = pneg %p1181_p11 }
 0x171   : > { %1119 = vrot.lane.b32.xlu0 %v1098_v61, %s1254_s30  ;;  %1124 = vrot.lane.b32.xlu1 %v1083_v32, %s1255_s5  ;;  %s1183_s30 = sshll.u32 %s1258_s19, 4  ;;  %s1184_s30 = int_to_ptr.vmem [resolvable:$false] %s1183_s30 }
 0x172   : > { %p1186_p13 = scmp.lt.s32.totalorder %s1565_s14, %s1184_s30 }
 0x175   : > { %1129 = vrot.lane.b32.xlu0 %v1088_v9, %s1255_s5  ;;  %1134 = vrot.lane.b32.xlu1 %v1093_v59, %s1255_s5 }
 0x179   : > { %1139 = vrot.lane.b32.xlu0 %v1098_v61, %s1255_s5  ;;  %1144 = vrot.lane.b32.xlu1 %v1083_v32, %s1256_s6  ;;  %s1185_s5 = scalar_lea.vmem %s1184_s30, 32 }
 0x17a   : > { %p1187_p0 = scmp.lt.s32.totalorder %s1185_s5, %s1179_s29 }
 0x17c   : > { %p1188_p1 = por %p1187_p0, %p1186_p13 }
 0x17d   : > { %1149 = vrot.lane.b32.xlu0 %v1088_v9, %s1256_s6  ;;  %1154 = vrot.lane.b32.xlu1 %v1093_v59, %s1256_s6 }
 0x17e   : > { %p1189_p2 = pnand %p1188_p1, %p1182_p12 }
 0x181   : > { %1159 = vrot.lane.b32.xlu0 %v1098_v61, %s1256_s6 }
 0x1c7   : > { %v1085_v49 = vpop.permute.xlu1 %1084 }
 0x1c8   : > { %v1087_v55 = vunpack.i.h.bf16 %v1085_v49  ;;  %v1086_v63 = vunpack.i.l.bf16 %v1085_v49 }
 0x1ca   : > { %v722_v5 = vsel %vm342_vm0, %v1086_v63, %v1087_v55 }
 0x1cb   : > { %v1090_v0 = vpop.permute.xlu0 %1089 }
 0x1cc   : > { %v1092_v1 = vunpack.i.h.bf16 %v1090_v0  ;;  %v1091_v2 = vunpack.i.l.bf16 %v1090_v0 }
 0x1ce   : > { %v723_v6 = vsel %vm342_vm0, %v1091_v2, %v1092_v1 }
 0x1cf   : > { %v986_v10 = vpack.c.bf16 %v723_v6, %v722_v5 }
 0x1d1   : > { %987 = vmatpush1.bf16.msra.mxu0 %v986_v10 }
 0x1d2   : > { %988 = vmatprep.subr.bf16.mxu0 %v1257_v56 }
 0x1d7   : > { %v1095_v12 = vpop.permute.xlu1 %1094 }
 0x1d8   : > { %v1097_v7 = vunpack.i.h.bf16 %v1095_v12  ;;  %v1096_v8 = vunpack.i.l.bf16 %v1095_v12 }
 0x1da   : > { %v724_v23 = vsel %vm342_vm0, %v1096_v8, %v1097_v7  ;;  %v807_v8 = vrot.slane %v1530_v29, %v1373_v11 }
 0x1db   : > { %v1100_v13 = vpop.permute.xlu0 %1099  ;;  %v1105_v16 = vpop.permute.xlu1 %1104 }
 0x1dc   : > { %v1102_v14 = vunpack.i.h.bf16 %v1100_v13  ;;  %v1101_v17 = vunpack.i.l.bf16 %v1100_v13  ;;  %v1107_v21 = vunpack.i.h.bf16 %v1105_v16  ;;  %v1106_v22 = vunpack.i.l.bf16 %v1105_v16 }
 0x1de   : > { %v725_v24 = vsel %vm342_vm0, %v1101_v17, %v1102_v14  ;;  %v746_v28 = vsel %vm431_vm1, %v1106_v22, %v1107_v21 }
 0x1df   : > { %v1110_v25 = vpop.permute.xlu0 %1109  ;;  %v1115_v15 = vpop.permute.xlu1 %1114  ;;  %v989_v18 = vpack.c.bf16 %v725_v24, %v724_v23 }
 0x1e0   : > { %v1112_v30 = vunpack.i.h.bf16 %v1110_v25  ;;  %v1111_v3 = vunpack.i.l.bf16 %v1110_v25  ;;  %v1117_v31 = vunpack.i.h.bf16 %v1115_v15  ;;  %v1116_v27 = vunpack.i.l.bf16 %v1115_v15 }
 0x1e1   : > { %990 = vmatpush1.bf16.msra.mxu0 %v989_v18 }
 0x1e2   : > { %991 = vmatprep.subr.bf16.mxu0 %v1257_v56  ;;  %v747_v32 = vsel %vm431_vm1, %v1111_v3, %v1112_v30  ;;  %v748_v20 = vsel %vm431_vm1, %v1116_v27, %v1117_v31 }
 0x1e3   : > { %v1120_v33 = vpop.permute.xlu0 %1119  ;;  %v1125_v34 = vpop.permute.xlu1 %1124  ;;  %v992_v35 = vpack.c.bf16 %v747_v32, %v746_v28 }
 0x1e4   : > { %v1122_v39 = vunpack.i.h.bf16 %v1120_v33  ;;  %v1121_v40 = vunpack.i.l.bf16 %v1120_v33  ;;  %v1127_v41 = vunpack.i.h.bf16 %v1125_v34  ;;  %v1126_v19 = vunpack.i.l.bf16 %v1125_v34 }
 0x1e5   : > { %993 = vmatpush1.bf16.msra.mxu0 %v992_v35 }
 0x1e6   : > { %994 = vmatprep.subr.bf16.mxu0 %v1257_v56  ;;  %v749_v42 = vsel %vm431_vm1, %v1121_v40, %v1122_v39  ;;  %v770_v45 = vsel %vm520_vm2, %v1126_v19, %v1127_v41 }
 0x1e7   : > { %v1130_v9 = vpop.permute.xlu0 %1129  ;;  %v1135_v4 = vpop.permute.xlu1 %1134  ;;  %v995_v26 = vpack.c.bf16 %v749_v42, %v748_v20 }
 0x1e8   : > { %v1132_v36 = vunpack.i.h.bf16 %v1130_v9  ;;  %v1131_v37 = vunpack.i.l.bf16 %v1130_v9  ;;  %v1137_v43 = vunpack.i.h.bf16 %v1135_v4  ;;  %v1136_v44 = vunpack.i.l.bf16 %v1135_v4 }
 0x1e9   : > { %996 = vmatpush1.bf16.msra.mxu0 %v995_v26 }
 0x1ea   : > { %997 = vmatprep.subr.bf16.mxu0 %v1257_v56  ;;  %v771_v46 = vsel %vm520_vm2, %v1131_v37, %v1132_v36  ;;  %v772_v57 = vsel %vm520_vm2, %v1136_v44, %v1137_v43 }
 0x1eb   : > { %v1140_v47 = vpop.permute.xlu0 %1139  ;;  %v1145_v48 = vpop.permute.xlu1 %1144  ;;  %v998_v50 = vpack.c.bf16 %v771_v46, %v770_v45 }
 0x1ec   : > { %v1142_v51 = vunpack.i.h.bf16 %v1140_v47  ;;  %v1141_v52 = vunpack.i.l.bf16 %v1140_v47  ;;  %v1147_v53 = vunpack.i.h.bf16 %v1145_v48  ;;  %v1146_v54 = vunpack.i.l.bf16 %v1145_v48 }
 0x1ed   : > { %999 = vmatpush1.bf16.msra.mxu0 %v998_v50 }
 0x1ee   : > { %1000 = vmatprep.subr.bf16.mxu0 %v1257_v56  ;;  %v773_v58 = vsel %vm520_vm2, %v1141_v52, %v1142_v51  ;;  %v794_v63 = vsel %vm609_vm3, %v1146_v54, %v1147_v53 }
 0x1ef   : > { %v1150_v59 = vpop.permute.xlu0 %1149  ;;  %v1155_v60 = vpop.permute.xlu1 %1154  ;;  %v1001_v61 = vpack.c.bf16 %v773_v58, %v772_v57 }
 0x1f0   : > { %v1152_v62 = vunpack.i.h.bf16 %v1150_v59  ;;  %v1151_v38 = vunpack.i.l.bf16 %v1150_v59  ;;  %v1157_v49 = vunpack.i.h.bf16 %v1155_v60  ;;  %v1156_v55 = vunpack.i.l.bf16 %v1155_v60 }
 0x1f1   : > { %1002 = vmatpush1.bf16.msra.mxu0 %v1001_v61 }
 0x1f2   : > { %1003 = vmatprep.subr.bf16.mxu0 %v1257_v56  ;;  %v795_v0 = vsel %vm609_vm3, %v1151_v38, %v1152_v62  ;;  %v796_v10 = vsel %vm609_vm3, %v1156_v55, %v1157_v49 }
 0x1f3   : > { %v1160_v1 = vpop.permute.xlu0 %1159  ;;  %v1004_v2 = vpack.c.bf16 %v795_v0, %v794_v63 }
 0x1f4   : > { %v1162_v5 = vunpack.i.h.bf16 %v1160_v1  ;;  %v1161_v6 = vunpack.i.l.bf16 %v1160_v1 }
 0x1f5   : > { %1005 = vmatpush1.bf16.msra.mxu0 %v1004_v2 }
 0x1f6   : > { %1006 = vmatprep.subr.bf16.mxu0 %v1257_v56  ;;  %v797_v12 = vsel %vm609_vm3, %v1161_v6, %v1162_v5 }
 0x1f7   : > { %v1007_v7 = vpack.c.bf16 %v797_v12, %v796_v10 }
 0x1f9   : > { %1008 = vmatpush1.bf16.msra.mxu0 %v1007_v7 }
 0x1fc   : > { %881 = vmatmul.mubr.f32.vlgmr.msra.gmra.mrb[0].mxu0 %v807_v8 }
 0x2cf   : > { %v882_v56 = vpop.f32.mrb[0].mxu0 }
 0x2d0   : > { %886 = vst [vmem:[%s201_s13] sm:$0x1] %v882_v56  ;;  %v884_v13 = vpop.f32.mrb[1].mxu0 }
 0x2d1   : > { %1192 = shalt.err (!%p1189_p2)
}
 0x2d2   : > { %s1193_s6 = scalar_lea.hbm %s1570_s27, 16  ;;  %s1197_s9 = scalar_lea.hbm %s1614_s4, 32 }
 0x2d3   : > { %p1194_p3 = scmp.ne.s32.totalorder %s1570_s27, %s1193_s6  ;;  %p1198_p8 = scmp.lt.u32.totalorder %s1570_s27, %s1614_s4 }
 0x2d4   : > { %p1199_p9 = scmp.lt.u32.totalorder %s1197_s9, %s1193_s6  ;;  %p1201_p11 = scmp.lt.u32.totalorder %s1193_s6, %s1570_s27 }
 0x2d5   : > { %p1195_p4 = pnand %p1194_p3, %p1322_p5 }
 0x2d6   : > { %p1200_p10 = por %p1199_p9, %p1198_p8 }
 0x2d7   : > { %p1196_p7 = pneg %p1195_p4 }
 0x2d8   : > { %p1202_p12 = por %p1201_p11, %p1200_p10 }
 0x2da   : > { %p1203_p13 = pnand %p1202_p12, %p1196_p7 }
 0x2dc   : > { %1206 = shalt.err (!%p1203_p13)
}
 0x2dd   : > { %1014 = dma.vmem_to_hbm [thread:$0]  (%p1322_p5), %s1565_s14, 16, %s1570_s27, %s888_s28  }
 0x2de PF: > { %p1026_p0 = scmp.ge.s32.totalorder %s1245_s18, 2  ;;  %s912_s12 = sand.u32 1, %s1233_s15  }
 0x2df   : > { %s913_s13 = scalar_lea.sflag [#allocation3], %s912_s12 }
 0x2e0   : > { %p1021_p1 = pnand %p1026_p0, %p1326_p6 }
 0x2e2   : > { %1228 = dma.done.wait (!%p1021_p1), %s913_s13, 16  }
 0x2e3   : > { %1230 = vsyncadd (!%p1021_p1), %s913_s13, 4294967280  ;;  %p15_p2 = scmp.ge.s32.totalorder %s1309_s21, 4   ;;  %s1620_s15 = smov %s1237_s16 }
 0x2e4   : > { %s1621_s16 = smov %s1241_s17  ;;  %s1622_s17 = smov %s1320_s24 }
 0x2e5   : > { %s1623_s18 = smov %s1309_s21  ;;  %17 = sbr.rel (!%p15_p2) target bundleno = 4 (0x4), region = 76 }
 0x2ec   :  { %917 = vsyncpa [#allocation3], 1 }
 0x2ed   :  { %919 = vsyncpa [#allocation3 + $0x1], 1 }
 0x2ee   :  { %920 = vsyncpa [#allocation4], 1 }
 0x2ef   :  { %922 = vsyncpa [#allocation4 + $0x1], 1 }

</bundles_post_ra>
